<compile_context>
chip_gen: v5e
topology: v5e:2x2
jax: 0.10.0
libtpu: 0.0.40
codegen_flags: <defaults>
</compile_context>

<pallas_src>
import functools

import jax
import jax.numpy as jnp
from jax.experimental import pallas as pl
from jax.experimental.pallas import tpu as pltpu

GAMMA = 2.0  # self.gamma (module default)


def _round_up(x, m):
    return ((x + m - 1) // m) * m


def _default_num_outer():
    """Number of 'parallel' outer blocks: 2 only if the chip has 2 TensorCores (v7x)."""
    try:
        info = pltpu.get_tpu_info()
        for attr in ("num_cores", "tensorcores_per_chip", "num_tensorcores"):
            v = getattr(info, attr, None)
            if isinstance(v, int) and v > 1:
                return v
    except Exception:
        pass
    return 1


def focal_loss_kernel(logits_ref, targets_ref, alpha_ref, out_ref, *, gamma, bf16_exp):
    """One (C_pad, TILE_N) column-tile of the focal loss.

    Grid = (num_outer, num_inner): axis 0 is independent ("parallel" -> both TCs on
    v7x, one partial sum per outer block), axis 1 is the accumulation axis. The
    (1, 1, 1) output block is resident across the inner axis and is the accumulator.
    """
    inner = pl.program_id(1)

    @pl.when(inner == 0)
    def _init():
        out_ref[...] = jnp.zeros_like(out_ref)

    x = logits_ref[...]                                    # (C_pad, TILE_N) native dtype
    tgt = targets_ref[...]                                 # (1, TILE_N) int32
    alpha_vals = alpha_ref[...]                            # (1, TILE_N) f32
    c_pad, tile_n = x.shape

    # Column max in the native dtype; upcast only the shifted values (one f32 tile,
    # not two) -- halves the largest intermediate for bf16 inputs.
    m = jnp.max(x, axis=0, keepdims=True)                  # (1, TILE_N)
    shifted = (x - m).astype(jnp.float32)                  # (C_pad, TILE_N) f32

    # Boolean target mask via sublane iota (classes live on sublanes in this layout).
    cls_idx = jax.lax.broadcasted_iota(jnp.int32, (c_pad, tile_n), 0)
    mask = cls_idx == tgt                                  # (C_pad, TILE_N) bool

    # Stable logsumexp cross-entropy (reduction='none'), fully lane-dense.
    if bf16_exp:
        # v6e/v7x only: bf16 exp on the EUP (~2x throughput); reductions stay in f32.
        # TODO(synk): do not enable on v5e (no bf16 EUP path); adds ~1e-3 rel error.
        e = jnp.exp(shifted.astype(jnp.bfloat16)).astype(jnp.float32)
    else:
        e = jnp.exp(shifted)
    sum_e = jnp.sum(e, axis=0, keepdims=True)              # (1, TILE_N)
    tgt_shifted = jnp.sum(jnp.where(mask, shifted, 0.0), axis=0, keepdims=True)
    ce = jnp.log(sum_e) - tgt_shifted                      # (1, TILE_N) f32

    # Focal weighting. gamma == 2.0 -> explicit square (VPU) instead of pow (EUP).
    pt = jnp.exp(-ce)
    omp = 1.0 - pt
    if float(gamma) == 2.0:
        focal_w = omp * omp
    elif float(gamma) == float(int(gamma)) and gamma >= 0:
        focal_w = omp ** int(gamma)
    else:
        focal_w = omp ** jnp.float32(gamma)
    focal = alpha_vals * focal_w * ce                      # padded cols: alpha == 0 -> 0

    # Scalar accumulation into the resident output block (no per-row scratch traffic).
    out_ref[...] += jnp.sum(focal).reshape(1, 1, 1)


def focal_loss(logits, targets, alpha, *, gamma=GAMMA, tile_n=None, num_outer=None,
               target_vmem_bytes=40 * 1024 * 1024, vmem_limit_bytes=48 * 1024 * 1024,
               bf16_exp=False):
    """logits: (N, C) float, targets: (N,) int, alpha: (C,) float -> scalar f32 mean focal loss."""
    n, c = logits.shape
    in_dtype = logits.dtype
    itemsize = jnp.dtype(in_dtype).itemsize

    # Per-row alpha gather in the wrapper (tiny XLA gather); N-on-lanes layout for
    # everything that enters the kernel.
    alpha_vals = alpha.astype(jnp.float32)[targets].reshape(1, n)     # (1, N)
    targets2d = targets.astype(jnp.int32).reshape(1, n)               # (1, N)
    logits_t = logits.T                                               # (C, N)

    # Pad the class dim (sublanes) to a multiple of 8 with a huge negative value:
    # exp underflows to 0, so the logsumexp and the target select stay exact.
    c_pad = max(8, _round_up(c, 8))
    if c_pad != c:
        logits_t = jnp.pad(logits_t, ((0, c_pad - c), (0, 0)), constant_values=-1e30)

    # Byte-budgeted tile sizing (multiple of 128 lanes): double-buffered input tile
    # plus ~3 f32 intermediates (shifted, exp, select temp) must fit the budget,
    # sized for v7x's 64 MiB VMEM with headroom (v5e/v6e have 128 MiB).
    # TODO(synk): for vocab-scale C, chunk the class dim with an online-max logsumexp
    # (extra inner loop) instead of one (C_pad, TILE_N) tile.
    per_col_bytes = c_pad * (2 * itemsize + 3 * 4) + 4 * 4
    if tile_n is None:
        tile_n = target_vmem_bytes // max(per_col_bytes, 1)
    tile_n = max(128, (min(int(tile_n), _round_up(n, 128)) // 128) * 128)

    num_tiles = pl.cdiv(n, tile_n)
    if num_outer is None:
        num_outer = _default_num_outer()
    num_outer = max(1, min(num_outer, num_tiles))      # "parallel" axis (2 TCs on v7x)
    num_inner = pl.cdiv(num_tiles, num_outer)          # "arbitrary" accumulation axis
    padded_n = num_outer * num_inner * tile_n

    pad = padded_n - n
    if pad:
        # Padded columns get alpha == 0 so they contribute exactly 0 to the sum.
        logits_t = jnp.pad(logits_t, ((0, 0), (0, pad)))
        targets2d = jnp.pad(targets2d, ((0, 0), (0, pad)))
        alpha_vals = jnp.pad(alpha_vals, ((0, 0), (0, pad)))

    col_block = lambda o, i: (0, o * num_inner + i)

    partial_sums = pl.pallas_call(
        functools.partial(focal_loss_kernel, gamma=gamma, bf16_exp=bf16_exp),
        out_shape=jax.ShapeDtypeStruct((num_outer, 1, 1), jnp.float32),
        grid_spec=pltpu.PrefetchScalarGridSpec(
            num_scalar_prefetch=0,
            grid=(num_outer, num_inner),
            in_specs=[
                pl.BlockSpec((c_pad, tile_n), col_block),   # logits tile (native dtype)
                pl.BlockSpec((1, tile_n), col_block),       # targets
                pl.BlockSpec((1, tile_n), col_block),       # per-row alpha
            ],
            out_specs=pl.BlockSpec((1, 1, 1), lambda o, i: (o, 0, 0)),
        ),
        compiler_params=pltpu.CompilerParams(
            dimension_semantics=("parallel", "arbitrary"),
            vmem_limit_bytes=vmem_limit_bytes,   # above the 16/32 MiB default, < v7x's 64 MiB
        ),
    )(logits_t, targets2d, alpha_vals)

    # reduction='mean' over the true (un-padded) batch size.
    return jnp.sum(partial_sums) / jnp.float32(n)


def focal_loss_ref(logits, targets, alpha, gamma=GAMMA):
    """Pure-JAX reference matching the PyTorch forward."""
    logp = jax.nn.log_softmax(logits.astype(jnp.float32), axis=-1)
    ce = -jnp.take_along_axis(logp, targets[:, None], axis=-1)[:, 0]
    pt = jnp.exp(-ce)
    a = alpha[targets].astype(jnp.float32)
    return jnp.mean(a * (1.0 - pt) ** gamma * ce)


if __name__ == "__main__":
    # Deterministic "dataset-derived" per-class alpha (mirrors __init__):
    # alpha[k] = 1 - count[k] / total_count
    # TODO(synk): the polars group_by alpha derivation is replaced by in-script counts.
    num_classes = 8
    counts = jnp.array([10, 20, 30, 40, 5, 15, 25, 35], dtype=jnp.float32)
    alpha = 1.0 - counts / jnp.sum(counts)                 # (C,)

    key = jax.random.PRNGKey(0)
    k1, k2, k3, k4, k5, k6 = jax.random.split(key, 6)

    # Case 1: single tile (grid (1, 1)), f32 logits.
    batch = 16
    logits = jax.random.normal(k1, (batch, num_classes), dtype=jnp.float32)
    targets = jax.random.randint(k2, (batch,), 0, num_classes, dtype=jnp.int32)
    out = jax.block_until_ready(focal_loss(logits, targets, alpha))
    ref = focal_loss_ref(logits, targets, alpha)
    assert jnp.allclose(out, ref, atol=1e-5, rtol=1e-5), (out, ref)

    # Case 2: exercises the 2-D grid (parallel outer x arbitrary inner accumulation)
    # plus padded-column masking (batch not a multiple of the 128-lane tile).
    batch2 = 300
    logits2 = jax.random.normal(k3, (batch2, num_classes), dtype=jnp.float32)
    targets2 = jax.random.randint(k4, (batch2,), 0, num_classes, dtype=jnp.int32)
    out2 = jax.block_until_ready(
        focal_loss(logits2, targets2, alpha, tile_n=128, num_outer=2))
    ref2 = focal_loss_ref(logits2, targets2, alpha)
    assert jnp.allclose(out2, ref2, atol=1e-5, rtol=1e-5), (out2, ref2)

    # Case 3: bf16 logits (the bandwidth-saving path); max/subtract run in bf16
    # in-kernel, so compare at bf16-level tolerance.
    batch3 = 64
    logits3 = jax.random.normal(k5, (batch3, num_classes), dtype=jnp.bfloat16)
    targets3 = jax.random.randint(k6, (batch3,), 0, num_classes, dtype=jnp.int32)
    out3 = jax.block_until_ready(focal_loss(logits3, targets3, alpha))
    ref3 = focal_loss_ref(logits3, targets3, alpha)
    assert jnp.allclose(out3, ref3, atol=5e-2, rtol=5e-2), (out3, ref3)

    print("KERNEL_OK")
</pallas_src>

<mosaic_0001>
module attributes {stable_mosaic.version = 11 : i64} {
  func.func @focal_loss_kernel(%arg0: i32, %arg1: i32, %arg2: memref<8x128xf32, #tpu.memory_space<vmem>>, %arg3: memref<1x128xi32, #tpu.memory_space<vmem>>, %arg4: memref<1x128xf32, #tpu.memory_space<vmem>>, %arg5: memref<1x1x1xf32, #tpu.memory_space<vmem>>) attributes {dimension_semantics = [#tpu.dimension_semantics<parallel>, #tpu.dimension_semantics<arbitrary>], iteration_bounds = array<i64: 1, 1>, scalar_prefetch = 0 : i64, scratch_operands = 0 : i64, tpu.core_type = #tpu.core_type<tc>, window_params = [{transform_indices = @transform_0, window_bounds = array<i64: 8, 128>}, {transform_indices = @transform_1, window_bounds = array<i64: 1, 128>}, {transform_indices = @transform_2, window_bounds = array<i64: 1, 128>}, {transform_indices = @transform_3, window_bounds = array<i64: 1, 1, 1>}]} {
    %c0_i32 = arith.constant 0 : i32
    %0 = arith.cmpi eq, %arg1, %c0_i32 : i32
    %1 = arith.extui %0 : i1 to i32
    %c0_i32_0 = arith.constant 0 : i32
    %2 = arith.cmpi ne, %1, %c0_i32_0 : i32
    scf.if %2 {
      %cst_18 = arith.constant 0.000000e+00 : f32
      %38 = vector.broadcast %cst_18 : f32 to vector<1x1x1xf32>
      %c0_19 = arith.constant 0 : index
      %c0_20 = arith.constant 0 : index
      %c0_21 = arith.constant 0 : index
      %39 = vector.load %arg5[%c0_19, %c0_20, %c0_21] : memref<1x1x1xf32, #tpu.memory_space<vmem>>, vector<1x1x1xf32>
      tpu.vector_store %arg5[%c0_19, %c0_20, %c0_21], %38 {strides = array<i32>} : memref<1x1x1xf32, #tpu.memory_space<vmem>>, vector<1x1x1xf32>,
    } else {
    }
    %c0 = arith.constant 0 : index
    %c0_1 = arith.constant 0 : index
    %3 = vector.load %arg2[%c0, %c0_1] : memref<8x128xf32, #tpu.memory_space<vmem>>, vector<8x128xf32>
    %c0_2 = arith.constant 0 : index
    %c0_3 = arith.constant 0 : index
    %4 = vector.load %arg3[%c0_2, %c0_3] : memref<1x128xi32, #tpu.memory_space<vmem>>, vector<1x128xi32>
    %c0_4 = arith.constant 0 : index
    %c0_5 = arith.constant 0 : index
    %5 = vector.load %arg4[%c0_4, %c0_5] : memref<1x128xf32, #tpu.memory_space<vmem>>, vector<1x128xf32>
    %cst = arith.constant dense<0xFF800000> : vector<128xf32>
    %6 = vector.multi_reduction <maximumf>, %3, %cst [0] : vector<8x128xf32> to vector<128xf32>
    %7 = vector.shape_cast %6 : vector<128xf32> to vector<1x128xf32>
    %8 = vector.broadcast %7 : vector<1x128xf32> to vector<8x128xf32>
    %9 = arith.subf %3, %8 : vector<8x128xf32>
    %10 = tpu.iota {dimensions = array<i32: 0>} : vector<8x128xi32>
    %11 = vector.broadcast %4 : vector<1x128xi32> to vector<8x128xi32>
    %12 = arith.cmpi eq, %10, %11 : vector<8x128xi32>
    %13 = math.exp %9 : vector<8x128xf32>
    %cst_6 = arith.constant dense<0.000000e+00> : vector<128xf32>
    %14 = vector.multi_reduction <add>, %13, %cst_6 [0] : vector<8x128xf32> to vector<128xf32>
    %15 = vector.shape_cast %14 : vector<128xf32> to vector<1x128xf32>
    %cst_7 = arith.constant 0.000000e+00 : f32
    %16 = vector.broadcast %cst_7 : f32 to vector<8x128xf32>
    %17 = arith.select %12, %9, %16 : vector<8x128xi1>, vector<8x128xf32>
    %cst_8 = arith.constant dense<0.000000e+00> : vector<128xf32>
    %18 = vector.multi_reduction <add>, %17, %cst_8 [0] : vector<8x128xf32> to vector<128xf32>
    %19 = vector.shape_cast %18 : vector<128xf32> to vector<1x128xf32>
    %20 = math.log %15 : vector<1x128xf32>
    %21 = arith.subf %20, %19 : vector<1x128xf32>
    %cst_9 = arith.constant 0.000000e+00 : f32
    %22 = vector.broadcast %cst_9 : f32 to vector<1x128xf32>
    %23 = arith.subf %22, %21 : vector<1x128xf32>
    %24 = math.exp %23 : vector<1x128xf32>
    %cst_10 = arith.constant 1.000000e+00 : f32
    %25 = vector.broadcast %cst_10 : f32 to vector<1x128xf32>
    %26 = arith.subf %25, %24 : vector<1x128xf32>
    %27 = arith.mulf %26, %26 : vector<1x128xf32>
    %28 = arith.mulf %5, %27 : vector<1x128xf32>
    %29 = arith.mulf %28, %21 : vector<1x128xf32>
    %c0_11 = arith.constant 0 : index
    %c0_12 = arith.constant 0 : index
    %c0_13 = arith.constant 0 : index
    %30 = vector.load %arg5[%c0_11, %c0_12, %c0_13] : memref<1x1x1xf32, #tpu.memory_space<vmem>>, vector<1x1x1xf32>
    %31 = vector.shape_cast %29 : vector<1x128xf32> to vector<1x1x128xf32>
    %cst_14 = arith.constant dense<0.000000e+00> : vector<1xf32>
    %32 = vector.multi_reduction <add>, %31, %cst_14 [1, 2] : vector<1x1x128xf32> to vector<1xf32>
    %33 = vector.shape_cast %32 : vector<1xf32> to vector<1x1x1xf32>
    %34 = vector.extract %33[0, 0, 0] : f32 from vector<1x1x1xf32>
    %35 = vector.broadcast %34 : f32 to vector<1x1x1xf32>
    %36 = arith.addf %30, %35 : vector<1x1x1xf32>
    %c0_15 = arith.constant 0 : index
    %c0_16 = arith.constant 0 : index
    %c0_17 = arith.constant 0 : index
    %37 = vector.load %arg5[%c0_15, %c0_16, %c0_17] : memref<1x1x1xf32, #tpu.memory_space<vmem>>, vector<1x1x1xf32>
    tpu.vector_store %arg5[%c0_15, %c0_16, %c0_17], %36 {strides = array<i32>} : memref<1x1x1xf32, #tpu.memory_space<vmem>>, vector<1x1x1xf32>,
    return
  }
  func.func @transform_0(%arg0: i32, %arg1: i32) -> (i32, i32) {
    %c1_i32 = arith.constant 1 : i32
    %0 = arith.muli %arg0, %c1_i32 : i32
    %1 = arith.addi %0, %arg1 : i32
    %c0_i32 = arith.constant 0 : i32
    %c0_i32_0 = arith.constant 0 : i32
    return %c0_i32, %1 : i32, i32
  }
  func.func @transform_1(%arg0: i32, %arg1: i32) -> (i32, i32) {
    %c1_i32 = arith.constant 1 : i32
    %0 = arith.muli %arg0, %c1_i32 : i32
    %1 = arith.addi %0, %arg1 : i32
    %c0_i32 = arith.constant 0 : i32
    %c0_i32_0 = arith.constant 0 : i32
    return %c0_i32, %1 : i32, i32
  }
  func.func @transform_2(%arg0: i32, %arg1: i32) -> (i32, i32) {
    %c1_i32 = arith.constant 1 : i32
    %0 = arith.muli %arg0, %c1_i32 : i32
    %1 = arith.addi %0, %arg1 : i32
    %c0_i32 = arith.constant 0 : i32
    %c0_i32_0 = arith.constant 0 : i32
    return %c0_i32, %1 : i32, i32
  }
  func.func @transform_3(%arg0: i32, %arg1: i32) -> (i32, i32, i32) {
    %c0_i32 = arith.constant 0 : i32
    %c0_i32_0 = arith.constant 0 : i32
    %c0_i32_1 = arith.constant 0 : i32
    return %arg0, %c0_i32, %c0_i32_0 : i32, i32, i32
  }
}

</mosaic_0001>

<bundles_post_ra>
// kernel: tpu_custom_call.1
= control target key start
LH: loop header
LB: loop body
LE: loop exit
PB: predicated region body
PF: predicated region fallthrough
CT: control target
= control target key end

     0   :  { %8 = vsyncpa [#allocation3], 0  ;;  %s275_s0 = inlined_call_operand.hbm [shape: f32[8,128], index: 0, kind: input, shape index: {}]   ;;  %s276_s1 = inlined_call_operand.hbm [shape: s32[1,128], index: 1, kind: input, shape index: {}]   ;;  %s277_s2 = inlined_call_operand.vmem [shape: f32[1,128], index: 2, kind: input, shape index: {}]   ;;  %s278_s3 = inlined_call_operand.hbm [shape: f32[1,1,1], index: 3, kind: output, shape index: {}]  }
   0x1   :  { %9 = vsyncpa [#allocation6], 0 }
   0x2   :  { %10 = vsyncpa [#allocation4], 0  ;;  %s19_s14 = sshll.u32 %s275_s0, 4  ;;  %s237_s15 = smov [#allocation2]   ;;  %s20_s14 = int_to_ptr.hbm [resolvable:$true] %s19_s14 }
   0x3   :  { %s21_s16 = sshll.u32 %s237_s15, 4  ;;  %s32_s19 = sshll.u32 %s276_s1, 4  ;;  %s22_s16 = int_to_ptr.vmem [resolvable:$true] %s21_s16  ;;  %s33_s19 = int_to_ptr.hbm [resolvable:$true] %s32_s19 }
   0x4   :  { %24 = dma.hbm_to_vmem [thread:$0]  %s20_s14, 128, %s22_s16, [#allocation3]  }
   0x5   :  { %s238_s20 = smov [#allocation5]  }
   0x6   :  { %s34_s21 = sshll.u32 %s238_s20, 4  ;;  %s35_s21 = int_to_ptr.vmem [resolvable:$true] %s34_s21 }
   0x7   :  { %37 = dma.hbm_to_vmem [thread:$0]  %s33_s19, 16, %s35_s21, [#allocation6]  }
   0x8   :  { %231 = dma.done.wait [#allocation3], 128  }
   0x9   :  { %232 = vsyncadd [#allocation3], 4294967168 }
   0xa   :  { %233 = dma.done.wait [#allocation6], 16  }
   0xb   :  { %234 = vsyncadd [#allocation6], 4294967280  ;;  %vm68_vm0 = vcmask 0   ;;  %v239_v0 = vmov 0.0   ;;  %v70_v1 = vld [vmem:[#allocation2] sm:$0xff]  ;;  %v80_v6 = vlaneseq  ;;  %vm110_vm2 = vcmask 1040384  }
   0xc   :  { %69 = vst.msk [vmem:[#allocation7] sm:$0x1] %vm68_vm0, %v239_v0  ;;  %v73_v2 = vrot.slane %v70_v1, 4  ;;  %v152_v10 = vld [vmem:[#allocation5] ss:$0 sm:$0xff]  ;;  %s240_s22 = smov [#allocation7]  }
   0xd   :  { %v81_v9 = vshrl.u32 %v80_v6, 7  ;;  %v72_v34 = vld [vmem:[%s277_s2] sm:$0x1]  ;;  %s130_s23 = sshll.u32 %s240_s22, 4  ;;  %s132_s2 = sshll.u32 %s278_s3, 4  ;;  %s131_s23 = int_to_ptr.vmem [resolvable:$true] %s130_s23  ;;  %s133_s2 = int_to_ptr.hbm [resolvable:$true] %s132_s2 }
   0xe   :  { %v74_v3 = vmax.f32 %v70_v1, %v73_v2 }
   0xf   :  { %vm83_vm1 = vcmp.eq.s32.totalorder %v81_v9, %v152_v10 }
  0x10   :  { %v75_v4 = vrot.slane %v74_v3, 2 }
  0x12   :  { %v76_v5 = vmax.f32 %v74_v3, %v75_v4 }
  0x13   :  { %v109_v46 = vld [vmem:[#allocation7] sm:$0x1] }
  0x14   :  { %v77_v7 = vrot.slane %v76_v5, 1 }
  0x16   :  { %v78_v8 = vmax.f32 %v76_v5, %v77_v7 }
  0x18   :  { %v79_v11 = vsub.f32 %v70_v1, %v78_v8 }
  0x1a   :  { %v84_v12 = vmul.f32 1.442695, %v79_v11  ;;  %v92_v13 = vsel %vm83_vm1, %v79_v11, 0.0 }
  0x1b   :  { %v93_v14 = vrot.slane %v92_v13, 4 }
  0x1c   :  { %153 = vpow2.f32 %v84_v12 }
  0x1d   :  { %v94_v17 = vadd.f32 %v93_v14, %v92_v13 }
  0x1f   :  { %v95_v20 = vrot.slane %v94_v17, 2 }
  0x21   :  { %v96_v23 = vadd.f32 %v95_v20, %v94_v17 }
  0x22   :  { %v154_v15 = vpop.eup %153 }
  0x23   :  { %v86_v16 = vrot.slane %v154_v15, 4  ;;  %v97_v25 = vrot.slane %v96_v23, 1 }
  0x25   :  { %v87_v18 = vadd.f32 %v154_v15, %v86_v16  ;;  %v98_v26 = vadd.f32 %v97_v25, %v96_v23 }
  0x27   :  { %v88_v19 = vrot.slane %v87_v18, 2 }
  0x29   :  { %v89_v21 = vadd.f32 %v88_v19, %v87_v18 }
  0x2b   :  { %v90_v22 = vrot.slane %v89_v21, 1 }
  0x2d   :  { %v91_v24 = vadd.f32 %v90_v22, %v89_v21 }
  0x2f   :  { %155 = vlog2.f32 %v91_v24 }
  0x35   :  { %v156_v27 = vpop.eup %155 }
  0x36   :  { %v100_v28 = vmul.f32 0.6931472, %v156_v27 }
  0x38   :  { %v101_v29 = vsub.f32 %v100_v28, %v98_v26 }
  0x3a   :  { %v102_v30 = vsub.f32 0.0, %v101_v29 }
  0x3c   :  { %v103_v31 = vmul.f32 1.442695, %v102_v30 }
  0x3e   :  { %157 = vpow2.f32 %v103_v31 }
  0x44   :  { %v158_v32 = vpop.eup %157 }
  0x45   :  { %v105_v33 = vsub.f32 1.0, %v158_v32 }
  0x47   :  { %v106_v35 = vmul.f32 %v105_v33, %v105_v33 }
  0x49   :  { %v107_v36 = vmul.f32 %v106_v35, %v72_v34 }
  0x4b   :  { %v108_v37 = vmul.f32 %v107_v36, %v101_v29 }
  0x4d   :  { %v111_v38 = vsel %vm110_vm2, %v108_v37, 0.0 }
  0x4e   :  { %112 = vadd.xlane.f32.xlu0 %v111_v38 }
  0xc1   :  { %v113_v39 = vpop.xlane.xlu0 %112 }
  0xc2   :  { %v114_v40 = vrot.slane %v113_v39, 4 }
  0xc4   :  { %v115_v41 = vadd.f32 %v114_v40, %v113_v39 }
  0xc6   :  { %v116_v42 = vrot.slane %v115_v41, 2 }
  0xc8   :  { %v117_v43 = vadd.f32 %v116_v42, %v115_v41 }
  0xca   :  { %v118_v44 = vrot.slane %v117_v43, 1 }
  0xcc   :  { %v119_v45 = vadd.f32 %v118_v44, %v117_v43 }
  0xce   :  { %146 = vpush %v119_v45 }
  0xff   :  { %s147_s26 = spop %146 }
 0x100   :  { %v121_v47 = vstv %s147_s26 }
 0x101   :  { %v122_v48 = vadd.f32 %v121_v47, %v109_v46 }
 0x103   :  { %124 = vst.msk [vmem:[#allocation7] sm:$0x1] %vm68_vm0, %v122_v48 }
 0x104   :  { %135 = dma.vmem_to_hbm [thread:$0]  %s131_s23, 16, %s133_s2, [#allocation4]  }
 0x105   :  { %235 = dma.done.wait [#allocation4], 16  }
 0x106   :  { %236 = vsyncadd [#allocation4], 4294967280 }
 0x107   :  { %140 = vsyncpa [#allocation3], 1 }
 0x108   :  { %141 = vsyncpa [#allocation6], 1 }
 0x109   :  { %142 = vsyncpa [#allocation4], 1 }

</bundles_post_ra>
